<compile_context>
chip_gen: v7x
topology: tpu7x:2x2x1
jax: 0.10.0
libtpu: 0.0.40
codegen_flags: <defaults>
</compile_context>

<pallas_src>
import math

import jax
import jax.numpy as jnp
from jax.experimental import pallas as pl
from jax.experimental.pallas import tpu as pltpu


_TARGET_TILE_BYTES = 2 << 20   # ~2 MiB / buffer (8 double-buffered bufs ~16 MiB)
_VMEM_LIMIT_BYTES = 48 << 20   # safe on v5e/v6e (128 MiB phys) and v7x (64 MiB phys)
_MIN_GRID_STEPS = 4            # >= 2 * num_cores so both v7x TCs get work


def _merge_kernel(w_ref, x1_ref, x2_ref, gt_ref, o_ref):
    # out = x1 + x2 * (1 + w * sigmoid(gt))  ==  x1 + x2 + sigmoid(gt) * x2 * w
    w = w_ref[0]                                            # SMEM scalar
    gate = jax.nn.sigmoid(gt_ref[...].astype(jnp.float32))  # EUP transcendental
    x2 = x2_ref[...].astype(jnp.float32)
    out = x1_ref[...].astype(jnp.float32) + x2 * (1.0 + w * gate)
    o_ref[...] = out.astype(o_ref.dtype)


def _sublane_multiple(itemsize):
    # Sublane packing multiple per dtype width (f32 / bf16 / int8-fp8).
    return {4: 8, 2: 16, 1: 32}.get(itemsize, 8)


def _pick_tile_rows(rows, row_bytes, sub,
                    target_bytes=_TARGET_TILE_BYTES, min_steps=_MIN_GRID_STEPS):
    """Rows per block: ~target_bytes/buffer, >= min_steps grid steps when the
    array allows it, rounded to the sublane-pack multiple, preferring an exact
    divisor of `rows` to avoid a masked ragged final block."""
    t = max(sub, target_bytes // max(row_bytes, 1))
    t = min(t, max(sub, -(-rows // min_steps)))      # keep >= min_steps steps
    if t >= rows:
        return rows                                  # single full-dim block (legal)
    t = max(sub, (t // sub) * sub)
    if t >= rows:
        return rows
    d = t                                            # look for a nearby divisor
    while d >= max(sub, t // 2):
        if rows % d == 0:
            return d
        d -= sub
    return t                                         # ragged tail handled by masking


def _choose_flat_layout(total, itemsize):
    """Lane-dense (rows, lanes) layout for the same-shape (fully elementwise) path."""
    sub = _sublane_multiple(itemsize)
    lanes = None
    for l in (2048, 1024, 512, 256, 128):            # best: no pad, sublane-friendly rows
        if total % l == 0 and (total // l) % sub == 0:
            lanes = l
            break
    if lanes is None:
        for l in (2048, 1024, 512, 256, 128):        # next best: no pad
            if total % l == 0:
                lanes = l
                break
    pad = 0
    if lanes is None:                                # rare fallback: minimal pad
        lanes = 128
        pad = (-total) % lanes
    rows = (total + pad) // lanes
    tile_rows = _pick_tile_rows(rows, lanes * itemsize, sub)
    return lanes, rows, tile_rows, pad


def _merge_same_shape(x1, x2, gt, w_arr):
    orig_shape = x1.shape
    out_dtype = x1.dtype
    total = x1.size
    itemsize = jnp.dtype(out_dtype).itemsize
    lanes, rows, tile_rows, pad = _choose_flat_layout(total, itemsize)

    def flat(a):
        a = a.reshape(-1)
        if pad:
            a = jnp.pad(a, (0, pad))
        return a.reshape(rows, lanes)

    block = pl.BlockSpec((tile_rows, lanes), lambda i: (i, 0))
    out = pl.pallas_call(
        _merge_kernel,
        out_shape=jax.ShapeDtypeStruct((rows, lanes), out_dtype),
        grid=(pl.cdiv(rows, tile_rows),),
        in_specs=[pl.BlockSpec(memory_space=pltpu.MemorySpace.SMEM),  # w scalar
                  block, block, block],                               # x1, x2, gt
        out_specs=block,
        compiler_params=pltpu.CompilerParams(
            dimension_semantics=("parallel",),
            vmem_limit_bytes=_VMEM_LIMIT_BYTES),
        cost_estimate=pl.CostEstimate(
            flops=4 * total,
            transcendentals=total,
            bytes_accessed=4 * total * itemsize),
    )(w_arr, flat(x1), flat(x2), flat(gt))

    if pad:
        return out.reshape(-1)[:total].reshape(orig_shape)
    return out.reshape(orig_shape)


def _merge_broadcast_gate(x1_3d, x2_3d, gt_3d, outer, mid, inner, w_arr):
    """x1/x2 are (outer, mid, inner); gt is (outer, 1, inner) and is broadcast
    over `mid` purely via its BlockSpec index_map (no HBM materialization)."""
    out_dtype = x1_3d.dtype
    itemsize = jnp.dtype(out_dtype).itemsize
    sub = _sublane_multiple(itemsize)
    tm = _pick_tile_rows(mid, inner * itemsize, sub)

    xspec = pl.BlockSpec((1, tm, inner), lambda o, m: (o, m, 0))
    gspec = pl.BlockSpec((1, 1, inner), lambda o, m: (o, 0, 0))   # broadcast over mid

    total = outer * mid * inner
    return pl.pallas_call(
        _merge_kernel,
        out_shape=jax.ShapeDtypeStruct((outer, mid, inner), out_dtype),
        grid=(outer, pl.cdiv(mid, tm)),
        in_specs=[pl.BlockSpec(memory_space=pltpu.MemorySpace.SMEM),  # w scalar
                  xspec, xspec, gspec],                               # x1, x2, gt
        out_specs=xspec,
        compiler_params=pltpu.CompilerParams(
            dimension_semantics=("parallel", "parallel"),
            vmem_limit_bytes=_VMEM_LIMIT_BYTES),
        cost_estimate=pl.CostEstimate(
            flops=4 * total,
            transcendentals=outer * inner,
            bytes_accessed=(3 * total + outer * inner) * itemsize),
    )(w_arr, x1_3d, x2_3d, gt_3d)


def merge(x1, x2, gt_pre, w):
    """out = x1 + x2 + sigmoid(gt_pre) * x2 * w   (Merge.forward)."""
    assert x1.shape == x2.shape, "x1 / x2 must have identical shapes"
    out_shape = x1.shape
    # SMEM scalar: works for Python floats and traced/learned w, no recompiles per value.
    w_arr = jnp.asarray(w, dtype=jnp.float32).reshape(1)

    gt = jnp.asarray(gt_pre)
    if gt.ndim < x1.ndim:                       # torch-style right-aligned broadcasting
        gt = gt.reshape((1,) * (x1.ndim - gt.ndim) + gt.shape)

    if gt.shape == x1.shape:
        return _merge_same_shape(x1, x2, gt, w_arr)

    # Broadcast gate: express the broadcast through the gt BlockSpec instead of
    # materializing a full-size gate in HBM.
    compatible = (gt.ndim == x1.ndim
                  and all(g in (1, d) for g, d in zip(gt.shape, x1.shape)))
    if compatible:
        bcast = [i for i, (g, d) in enumerate(zip(gt.shape, x1.shape))
                 if g == 1 and d != 1]
        a, b = min(bcast), max(bcast) + 1
        if all(gt.shape[i] == 1 for i in range(a, b)):       # contiguous broadcast block
            outer = math.prod(x1.shape[:a])
            mid = math.prod(x1.shape[a:b])
            inner = math.prod(x1.shape[b:])
            itemsize = jnp.dtype(x1.dtype).itemsize
            sub = _sublane_multiple(itemsize)
            # Worthwhile only when the inner slab is lane-sized and fits VMEM.
            if inner >= 128 and sub * inner * itemsize <= (6 << 20):
                out = _merge_broadcast_gate(
                    x1.reshape(outer, mid, inner),
                    x2.reshape(outer, mid, inner),
                    gt.reshape(outer, 1, inner),
                    outer, mid, inner, w_arr)
                return out.reshape(out_shape)

    # TODO(synk): non-contiguous / tiny-inner broadcast patterns still materialize
    # the gate in HBM; extend the BlockSpec mapping if these ever show up.
    gt = jnp.broadcast_to(gt, x1.shape)
    return _merge_same_shape(x1, x2, gt, w_arr)


if __name__ == "__main__":
    key = jax.random.PRNGKey(0)
    k1, k2, k3, k4 = jax.random.split(key, 4)

    B, C, H, W = 2, 4, 16, 16  # NCHW, same convention as the PyTorch module
    x1 = jax.random.normal(k1, (B, C, H, W), dtype=jnp.float32)
    x2 = jax.random.normal(k2, (B, C, H, W), dtype=jnp.float32)
    gt_full = jax.random.normal(k3, (B, C, H, W), dtype=jnp.float32)
    gt_bcast = jax.random.normal(k4, (B, 1, H, W), dtype=jnp.float32)
    w = 0.5  # scalar weight (Merge.__init__ defines no parameters)

    # 1) Same-shape gate -> flat lane-dense streaming path.
    out_full = jax.block_until_ready(merge(x1, x2, gt_full, w))
    ref_full = x1 + x2 + jax.nn.sigmoid(gt_full) * x2 * w
    assert out_full.shape == ref_full.shape
    assert jnp.allclose(out_full, ref_full, atol=1e-5, rtol=1e-5)

    # 2) (B,1,H,W) gate -> broadcast expressed in the gt BlockSpec (no HBM gate).
    out_b = jax.block_until_ready(merge(x1, x2, gt_bcast, w))
    ref_b = x1 + x2 + jax.nn.sigmoid(gt_bcast) * x2 * w
    assert out_b.shape == ref_b.shape
    assert jnp.allclose(out_b, ref_b, atol=1e-5, rtol=1e-5)

    # 3) Traced w under jit (SMEM scalar path: no ConcretizationTypeError,
    #    no per-value recompilation).
    out_j = jax.block_until_ready(jax.jit(merge)(x1, x2, gt_bcast, jnp.float32(0.7)))
    ref_j = x1 + x2 + jax.nn.sigmoid(gt_bcast) * x2 * 0.7
    assert jnp.allclose(out_j, ref_j, atol=1e-5, rtol=1e-5)

    print("KERNEL_OK")
</pallas_src>

<mosaic_0001>
module attributes {stable_mosaic.version = 11 : i64} {
  func.func @_merge_kernel(%arg0: i32, %arg1: memref<1xf32, #tpu.memory_space<smem>>, %arg2: memref<8x256xf32, #tpu.memory_space<vmem>>, %arg3: memref<8x256xf32, #tpu.memory_space<vmem>>, %arg4: memref<8x256xf32, #tpu.memory_space<vmem>>, %arg5: memref<8x256xf32, #tpu.memory_space<vmem>>) attributes {dimension_semantics = [#tpu.dimension_semantics<parallel>], iteration_bounds = array<i64: 1>, scalar_prefetch = 0 : i64, scratch_operands = 0 : i64, tpu.core_type = #tpu.core_type<tc>, window_params = [{transform_indices = @transform_0, window_bounds = array<i64: 1>}, {transform_indices = @transform_1, window_bounds = array<i64: 8, 256>}, {transform_indices = @transform_2, window_bounds = array<i64: 8, 256>}, {transform_indices = @transform_3, window_bounds = array<i64: 8, 256>}, {transform_indices = @transform_4, window_bounds = array<i64: 8, 256>}]} {
    %c0 = arith.constant 0 : index
    %0 = memref.load %arg1[%c0] : memref<1xf32, #tpu.memory_space<smem>>
    %c0_0 = arith.constant 0 : index
    %c0_1 = arith.constant 0 : index
    %1 = vector.load %arg4[%c0_0, %c0_1] : memref<8x256xf32, #tpu.memory_space<vmem>>, vector<8x256xf32>
    %2 = arith.negf %1 : vector<8x256xf32>
    %3 = math.exp %2 : vector<8x256xf32>
    %cst = arith.constant 1.000000e+00 : f32
    %4 = vector.broadcast %cst : f32 to vector<8x256xf32>
    %5 = arith.addf %4, %3 : vector<8x256xf32>
    %6 = arith.divf %4, %5 : vector<8x256xf32>
    %c0_2 = arith.constant 0 : index
    %c0_3 = arith.constant 0 : index
    %7 = vector.load %arg3[%c0_2, %c0_3] : memref<8x256xf32, #tpu.memory_space<vmem>>, vector<8x256xf32>
    %c0_4 = arith.constant 0 : index
    %c0_5 = arith.constant 0 : index
    %8 = vector.load %arg2[%c0_4, %c0_5] : memref<8x256xf32, #tpu.memory_space<vmem>>, vector<8x256xf32>
    %9 = vector.broadcast %0 : f32 to vector<8x256xf32>
    %10 = arith.mulf %9, %6 : vector<8x256xf32>
    %cst_6 = arith.constant 1.000000e+00 : f32
    %11 = vector.broadcast %cst_6 : f32 to vector<8x256xf32>
    %12 = arith.addf %11, %10 : vector<8x256xf32>
    %13 = arith.mulf %7, %12 : vector<8x256xf32>
    %14 = arith.addf %8, %13 : vector<8x256xf32>
    %c0_7 = arith.constant 0 : index
    %c0_8 = arith.constant 0 : index
    %15 = vector.load %arg5[%c0_7, %c0_8] : memref<8x256xf32, #tpu.memory_space<vmem>>, vector<8x256xf32>
    tpu.vector_store %arg5[%c0_7, %c0_8], %14 {strides = array<i32>} : memref<8x256xf32, #tpu.memory_space<vmem>>, vector<8x256xf32>,
    return
  }
  func.func @transform_0(%arg0: i32) -> i32 {
    %c0_i32 = arith.constant 0 : i32
    %c0_i32_0 = arith.constant 0 : i32
    return %c0_i32 : i32
  }
  func.func @transform_1(%arg0: i32) -> (i32, i32) {
    %c0_i32 = arith.constant 0 : i32
    %c0_i32_0 = arith.constant 0 : i32
    return %arg0, %c0_i32 : i32, i32
  }
  func.func @transform_2(%arg0: i32) -> (i32, i32) {
    %c0_i32 = arith.constant 0 : i32
    %c0_i32_0 = arith.constant 0 : i32
    return %arg0, %c0_i32 : i32, i32
  }
  func.func @transform_3(%arg0: i32) -> (i32, i32) {
    %c0_i32 = arith.constant 0 : i32
    %c0_i32_0 = arith.constant 0 : i32
    return %arg0, %c0_i32 : i32, i32
  }
  func.func @transform_4(%arg0: i32) -> (i32, i32) {
    %c0_i32 = arith.constant 0 : i32
    %c0_i32_0 = arith.constant 0 : i32
    return %arg0, %c0_i32 : i32, i32
  }
}

</mosaic_0001>

<bundles_post_ra>
// kernel: tpu_custom_call.1
= control target key start
LH: loop header
LB: loop body
LE: loop exit
PB: predicated region body
PF: predicated region fallthrough
CT: control target
= control target key end

     0   :  { %10 = vsyncpa [#allocation4], 0  ;;  %s288_s0 = inlined_call_operand.<no memory space> [shape: f32[1], index: 0, kind: input, shape index: {}]   ;;  %s289_s1 = inlined_call_operand.hbm [shape: f32[8,256], index: 1, kind: input, shape index: {}]   ;;  %s290_s2 = inlined_call_operand.hbm [shape: f32[8,256], index: 2, kind: input, shape index: {}]   ;;  %s291_s3 = inlined_call_operand.hbm [shape: f32[8,256], index: 3, kind: input, shape index: {}]   ;;  %s292_s4 = inlined_call_operand.hbm [shape: f32[8,256], index: 4, kind: output, shape index: {}]  }
   0x1   :  { %11 = vsyncpa [#allocation7], 0 }
   0x2   :  { %12 = vsyncpa [#allocation5], 0  ;;  %s208_s15 = smov [#allocation6]   ;;  %s209_s17 = smov [#allocation3]  }
   0x3   :  { %s31_s16 = sshll.u32 %s208_s15, 4  ;;  %s21_s18 = sshll.u32 %s209_s17, 4  ;;  %s32_s16 = int_to_ptr.vmem [resolvable:$true] %s31_s16  ;;  %s22_s18 = int_to_ptr.vmem [resolvable:$true] %s21_s18 }
   0x4   :  { %s114_s21 = scalar_lea.hbm %s290_s2, 256 }
   0x5   :  { %p115_p0 = scmp.ne.s32.totalorder %s290_s2, %s114_s21  ;;  %p118_p1 = scmp.lt.u32.totalorder %s114_s21, %s290_s2 }
   0x7   :  { %p120_p2 = pnand %p118_p1, %p115_p0 }
   0x9   :  { %123 = shalt.err (!%p120_p2)
}
   0xa   :  { %s124_s26 = scalar_lea.vmem %s32_s16, 256  ;;  %p129_p4 = scmp.lt.s32.totalorder %s32_s16, %s32_s16 }
   0xb   :  { %p125_p3 = scmp.ne.s32.totalorder %s32_s16, %s124_s26  ;;  %p130_p5 = scmp.lt.s32.totalorder %s124_s26, %s124_s26 }
   0xd   :  { %p131_p6 = por %p130_p5, %p129_p4 }
   0xf   :  { %p132_p7 = pnand %p131_p6, %p125_p3 }
  0x11   :  { %135 = shalt.err (!%p132_p7)
}
  0x12   :  { %34 = dma.hbm_to_vmem [thread:$0]  %s290_s2, 256, %s32_s16, [#allocation7]  }
  0x13   :  { %s136_s5 = scalar_lea.hbm %s289_s1, 256 }
  0x14   :  { %p137_p8 = scmp.ne.s32.totalorder %s289_s1, %s136_s5  ;;  %p140_p9 = scmp.lt.u32.totalorder %s136_s5, %s289_s1 }
  0x16   :  { %p142_p10 = pnand %p140_p9, %p137_p8 }
  0x18   :  { %145 = shalt.err (!%p142_p10)
}
  0x19   :  { %s146_s10 = scalar_lea.vmem %s22_s18, 256  ;;  %p151_p12 = scmp.lt.s32.totalorder %s22_s18, %s22_s18 }
  0x1a   :  { %p147_p11 = scmp.ne.s32.totalorder %s22_s18, %s146_s10  ;;  %p152_p13 = scmp.lt.s32.totalorder %s146_s10, %s146_s10 }
  0x1c   :  { %p153_p0 = por %p152_p13, %p151_p12 }
  0x1e   :  { %p154_p1 = pnand %p153_p0, %p147_p11 }
  0x20   :  { %157 = shalt.err (!%p154_p1)
}
  0x21   :  { %24 = dma.hbm_to_vmem [thread:$0]  %s289_s1, 256, %s22_s18, [#allocation4]  }
  0x22   :  { %s210_s12 = smov [#allocation8]   ;;  %s158_s16 = scalar_lea.hbm %s291_s3, 256 }
  0x23   :  { %s41_s13 = sshll.u32 %s210_s12, 4  ;;  %p159_p2 = scmp.ne.s32.totalorder %s291_s3, %s158_s16  ;;  %s42_s13 = int_to_ptr.vmem [resolvable:$true] %s41_s13 }
  0x24   :  { %p162_p3 = scmp.lt.u32.totalorder %s158_s16, %s291_s3 }
  0x26   :  { %p164_p4 = pnand %p162_p3, %p159_p2 }
  0x28   :  { %167 = shalt.err (!%p164_p4)
}
  0x29   :  { %s168_s22 = scalar_lea.vmem %s42_s13, 256  ;;  %p173_p6 = scmp.lt.s32.totalorder %s42_s13, %s42_s13 }
  0x2a   :  { %p169_p5 = scmp.ne.s32.totalorder %s42_s13, %s168_s22  ;;  %p174_p7 = scmp.lt.s32.totalorder %s168_s22, %s168_s22 }
  0x2c   :  { %p175_p8 = por %p174_p7, %p173_p6 }
  0x2e   :  { %p176_p9 = pnand %p175_p8, %p169_p5 }
  0x30   :  { %179 = shalt.err (!%p176_p9)
}
  0x31   :  { %44 = dma.hbm_to_vmem [thread:$0]  %s291_s3, 256, %s42_s13, [#allocation7]  }
  0x32   :  { %202 = dma.done.wait [#allocation4], 256  }
  0x33   :  { %203 = vsyncadd [#allocation4], 4294967040 }
  0x34   :  { %204 = dma.done.wait [#allocation7], 512  }
  0x35   :  { %205 = vsyncadd [#allocation7], 4294966784  ;;  %v55_v0 = vld [vmem:[#allocation8] sm:$0xff]  ;;  %v56_v2 = vld [vmem:[#allocation8 + $0x8] sm:$0xff]  ;;  %v73_v8 = vstv %s288_s0  ;;  %s211_s3 = smov [#allocation9]  }
  0x36   :  { %v100_v1 = vmul.f32 -1.442695, %v55_v0  ;;  %v101_v3 = vmul.f32 -1.442695, %v56_v2  ;;  %v69_v12 = vld [vmem:[#allocation6] sm:$0xff]  ;;  %v70_v15 = vld [vmem:[#allocation6 + $0x8] sm:$0xff] }
  0x37   :  { %v71_v16 = vld [vmem:[#allocation3] sm:$0xff]  ;;  %v72_v19 = vld [vmem:[#allocation3 + $0x8] sm:$0xff]  ;;  %s90_s25 = sshll.u32 %s211_s3, 4  ;;  %s91_s25 = int_to_ptr.vmem [resolvable:$true] %s90_s25 }
  0x38   :  { %106 = vpow2.f32 %v100_v1  ;;  %s180_s0 = scalar_lea.vmem %s91_s25, 256  ;;  %p185_p11 = scmp.lt.s32.totalorder %s91_s25, %s91_s25 }
  0x39   :  { %108 = vpow2.f32 %v101_v3  ;;  %p181_p10 = scmp.ne.s32.totalorder %s91_s25, %s180_s0  ;;  %p186_p12 = scmp.lt.s32.totalorder %s180_s0, %s180_s0 }
  0x3b   :  { %p187_p13 = por %p186_p12, %p185_p11 }
  0x3d   :  { %p188_p0 = pnand %p187_p13, %p181_p10 }
  0x42   :  { %v107_v4 = vpop.eup %106 }
  0x43   :  { %v109_v5 = vpop.eup %108  ;;  %v63_v6 = vadd.f32 1.0, %v107_v4 }
  0x44   :  { %v64_v7 = vadd.f32 1.0, %v109_v5 }
  0x45   :  { %110 = vrcp.f32 %v63_v6 }
  0x46   :  { %112 = vrcp.f32 %v64_v7 }
  0x4f   :  { %v111_v9 = vpop.eup %110 }
  0x50   :  { %v113_v10 = vpop.eup %112  ;;  %v74_v11 = vmul.f32 %v111_v9, %v73_v8 }
  0x51   :  { %v75_v13 = vmul.f32 %v113_v10, %v73_v8 }
  0x52   :  { %v76_v14 = vadd.f32 1.0, %v74_v11 }
  0x53   :  { %v77_v17 = vadd.f32 1.0, %v75_v13 }
  0x54   :  { %v78_v18 = vmul.f32 %v76_v14, %v69_v12 }
  0x55   :  { %v79_v20 = vmul.f32 %v77_v17, %v70_v15 }
  0x56   :  { %v80_v21 = vadd.f32 %v78_v18, %v71_v16 }
  0x57   :  { %v81_v22 = vadd.f32 %v79_v20, %v72_v19 }
  0x58   :  { %82 = vst [vmem:[#allocation9] sm:$0xff] %v80_v21 }
  0x59   :  { %83 = vst [vmem:[#allocation9 + $0x8] sm:$0xff] %v81_v22 }
  0x5a   :  { %191 = shalt.err (!%p188_p0)
}
  0x5b   :  { %s192_s28 = scalar_lea.hbm %s292_s4, 256 }
  0x5c   :  { %p193_p1 = scmp.ne.s32.totalorder %s292_s4, %s192_s28  ;;  %p196_p2 = scmp.lt.u32.totalorder %s192_s28, %s292_s4 }
  0x5e   :  { %p198_p3 = pnand %p196_p2, %p193_p1 }
  0x60   :  { %201 = shalt.err (!%p198_p3)
}
  0x61   :  { %93 = dma.vmem_to_hbm [thread:$0]  %s91_s25, 256, %s292_s4, [#allocation5]  }
  0x62   :  { %206 = dma.done.wait [#allocation5], 256  }
  0x63   :  { %207 = vsyncadd [#allocation5], 4294967040 }
  0x64   :  { %97 = vsyncpa [#allocation4], 1 }
  0x65   :  { %98 = vsyncpa [#allocation7], 1 }
  0x66   :  { %99 = vsyncpa [#allocation5], 1 }

</bundles_post_ra>
